<compile_context>
chip_gen: v7x
topology: tpu7x:2x2x1
jax: 0.10.0
libtpu: 0.0.40
codegen_flags: <defaults>
</compile_context>

<pallas_src>
import jax
import jax.numpy as jnp
from jax.experimental import pallas as pl
from jax.experimental.pallas import tpu as pltpu

INPUT_SIZE = 784
HIDDEN_SIZE = 100
NUM_CLASSES = 10

HIDDEN_PAD = 128   # 100 -> 128 (lane-dense hidden dim)
CLASS_PAD = 128    # 10  -> 128 (lane-dense output store)
DEFAULT_BATCH_TILE = 2048


def _round_up(n, m):
    return ((n + m - 1) // m) * m


def digitnet_kernel(x_ref, w1_ref, b1_ref, w2_ref, b2_ref, o_ref):
    # layer1: [TB, 784] @ [784, 128] -> f32 accumulate on the MXU
    x = x_ref[...].astype(w1_ref.dtype)
    h = jnp.dot(x, w1_ref[...], preferred_element_type=jnp.float32)
    # bias + ReLU in f32 (padded hidden cols have w=0, b=0 -> stay 0)
    h = jnp.maximum(h + b1_ref[...], 0.0)
    # layer2: [TB, 128] @ [128, 128] -> f32 accumulate
    out = jnp.dot(h.astype(w2_ref.dtype), w2_ref[...],
                  preferred_element_type=jnp.float32)
    o_ref[...] = (out + b2_ref[...]).astype(o_ref.dtype)


def prepare_params(w1, b1, w2, b2, *, compute_dtype=jnp.bfloat16):
    """One-time layout prep: transpose + zero-pad weights, reshape biases.

    w1: [100, 784], b1: [100], w2: [10, 100], b2: [10]
    Returns (w1_t [784,128], b1_p [1,128] f32, w2_t [128,128], b2_p [1,128] f32).
    compute_dtype=bfloat16 (default) halves matmul-input bytes on all TPU gens;
    accumulation and the bias/ReLU epilogue stay f32.
    """
    w1_t = jnp.zeros((INPUT_SIZE, HIDDEN_PAD), compute_dtype)
    w1_t = w1_t.at[:, :HIDDEN_SIZE].set(w1.T.astype(compute_dtype))
    b1_p = jnp.zeros((1, HIDDEN_PAD), jnp.float32)
    b1_p = b1_p.at[0, :HIDDEN_SIZE].set(b1.astype(jnp.float32))

    w2_t = jnp.zeros((HIDDEN_PAD, CLASS_PAD), compute_dtype)
    w2_t = w2_t.at[:HIDDEN_SIZE, :NUM_CLASSES].set(w2.T.astype(compute_dtype))
    b2_p = jnp.zeros((1, CLASS_PAD), jnp.float32)
    b2_p = b2_p.at[0, :NUM_CLASSES].set(b2.astype(jnp.float32))
    return w1_t, b1_p, w2_t, b2_p


def digitnet_forward(x, params, *, batch_tile=DEFAULT_BATCH_TILE,
                     out_dtype=jnp.float32):
    """x: [B, 784] (f32 or bf16); params from prepare_params().

    Returns [B, 10] logits in out_dtype.
    """
    w1_t, b1_p, w2_t, b2_p = params
    B = x.shape[0]

    # Batch tile:
    #   * multiple of 8 (BlockSpec sublane rule),
    #   * <= ~B/2 (rounded) so the grid has >=2 steps for v7x megacore,
    #   * capped by batch_tile so the double-buffered footprint fits VMEM
    #     (tb=2048 f32: ~15.5 MiB < 32 MiB scoped limit on every generation).
    tb = min(_round_up(batch_tile, 8), _round_up(pl.cdiv(B, 2), 8))
    grid = (pl.cdiv(B, tb),)

    # Output rows rounded to 8 only; ragged last block is masked by Pallas.
    # No jnp.pad of x -> no extra HBM copy of the dominant input stream.
    B_out = _round_up(B, 8)

    flops = 2 * grid[0] * tb * (INPUT_SIZE * HIDDEN_PAD + HIDDEN_PAD * CLASS_PAD)
    bytes_accessed = (
        B * INPUT_SIZE * x.dtype.itemsize
        + w1_t.size * w1_t.dtype.itemsize
        + w2_t.size * w2_t.dtype.itemsize
        + (b1_p.size + b2_p.size) * 4
        + B_out * CLASS_PAD * jnp.dtype(out_dtype).itemsize
    )

    out_pad = pl.pallas_call(
        digitnet_kernel,
        out_shape=jax.ShapeDtypeStruct((B_out, CLASS_PAD), out_dtype),
        grid=grid,
        in_specs=[
            # x streamed per batch tile (auto double-buffered).
            pl.BlockSpec((tb, INPUT_SIZE), lambda i: (i, 0)),
            # Weights / biases VMEM-resident across all grid steps.
            pl.BlockSpec((INPUT_SIZE, HIDDEN_PAD), lambda i: (0, 0)),
            pl.BlockSpec((1, HIDDEN_PAD), lambda i: (0, 0)),
            pl.BlockSpec((HIDDEN_PAD, CLASS_PAD), lambda i: (0, 0)),
            pl.BlockSpec((1, CLASS_PAD), lambda i: (0, 0)),
        ],
        out_specs=pl.BlockSpec((tb, CLASS_PAD), lambda i: (i, 0)),
        compiler_params=pltpu.CompilerParams(
            dimension_semantics=("parallel",),          # 2 TCs on v7x
            vmem_limit_bytes=32 * 1024 * 1024,          # portable incl. v7x
        ),
        cost_estimate=pl.CostEstimate(
            flops=flops, transcendentals=0, bytes_accessed=bytes_accessed),
    )(x, w1_t, b1_p, w2_t, b2_p)

    # Strip the row round-up and the lane-padding of the class dim.
    return out_pad[:B, :NUM_CLASSES]


def init_params(key):
    """Deterministic init mimicking nn.Linear's uniform(-1/sqrt(fan_in), ...)."""
    k1, k2, k3, k4 = jax.random.split(key, 4)
    bound1 = 1.0 / jnp.sqrt(INPUT_SIZE)
    bound2 = 1.0 / jnp.sqrt(HIDDEN_SIZE)
    w1 = jax.random.uniform(k1, (HIDDEN_SIZE, INPUT_SIZE), jnp.float32,
                            -bound1, bound1)
    b1 = jax.random.uniform(k2, (HIDDEN_SIZE,), jnp.float32, -bound1, bound1)
    w2 = jax.random.uniform(k3, (NUM_CLASSES, HIDDEN_SIZE), jnp.float32,
                            -bound2, bound2)
    b2 = jax.random.uniform(k4, (NUM_CLASSES,), jnp.float32, -bound2, bound2)
    return w1, b1, w2, b2


if __name__ == "__main__":
    key = jax.random.PRNGKey(0)
    kx, kp = jax.random.split(key)
    w1, b1, w2, b2 = init_params(kp)

    # Ragged batch on purpose (B not a multiple of 8 or the tile) to exercise
    # the cdiv grid + masked last block.
    B = 20
    x = jax.random.normal(kx, (B, INPUT_SIZE), jnp.float32)
    ref = jnp.maximum(x @ w1.T + b1, 0.0) @ w2.T + b2

    # --- f32 compute path: exact check against the reference ---------------
    params_f32 = prepare_params(w1, b1, w2, b2, compute_dtype=jnp.float32)
    out_f32 = jax.block_until_ready(
        digitnet_forward(x, params_f32, batch_tile=16, out_dtype=jnp.float32))
    assert out_f32.shape == (B, NUM_CLASSES)
    assert jnp.allclose(out_f32, ref, atol=1e-4, rtol=1e-4)

    # --- bf16 default path: half the HBM traffic, looser tolerance ---------
    params_bf16 = prepare_params(w1, b1, w2, b2)        # bf16 weights
    x_bf16 = x.astype(jnp.bfloat16)                     # producer-side cast
    out_bf16 = jax.block_until_ready(
        digitnet_forward(x_bf16, params_bf16, out_dtype=jnp.bfloat16))
    assert out_bf16.shape == (B, NUM_CLASSES)
    assert jnp.allclose(out_bf16.astype(jnp.float32), ref, atol=0.1, rtol=0.1)

    print("KERNEL_OK")
</pallas_src>

<mosaic_0001>
module attributes {stable_mosaic.version = 11 : i64} {
  func.func @digitnet_kernel(%arg0: i32, %arg1: memref<16x784xf32, #tpu.memory_space<vmem>>, %arg2: memref<784x128xf32, #tpu.memory_space<vmem>>, %arg3: memref<1x128xf32, #tpu.memory_space<vmem>>, %arg4: memref<128x128xf32, #tpu.memory_space<vmem>>, %arg5: memref<1x128xf32, #tpu.memory_space<vmem>>, %arg6: memref<16x128xf32, #tpu.memory_space<vmem>>) attributes {dimension_semantics = [#tpu.dimension_semantics<parallel>], iteration_bounds = array<i64: 2>, scalar_prefetch = 0 : i64, scratch_operands = 0 : i64, tpu.core_type = #tpu.core_type<tc>, window_params = [{transform_indices = @transform_0, window_bounds = array<i64: 16, 784>}, {pipeline_mode = #tpu.pipeline_mode<synchronous>, transform_indices = @transform_1, window_bounds = array<i64: 784, 128>}, {pipeline_mode = #tpu.pipeline_mode<synchronous>, transform_indices = @transform_2, window_bounds = array<i64: 1, 128>}, {pipeline_mode = #tpu.pipeline_mode<synchronous>, transform_indices = @transform_3, window_bounds = array<i64: 128, 128>}, {pipeline_mode = #tpu.pipeline_mode<synchronous>, transform_indices = @transform_4, window_bounds = array<i64: 1, 128>}, {transform_indices = @transform_5, window_bounds = array<i64: 16, 128>}]} {
    %c0 = arith.constant 0 : index
    %c0_0 = arith.constant 0 : index
    %0 = vector.load %arg1[%c0, %c0_0] : memref<16x784xf32, #tpu.memory_space<vmem>>, vector<16x784xf32>
    %c0_1 = arith.constant 0 : index
    %c0_2 = arith.constant 0 : index
    %1 = vector.load %arg2[%c0_1, %c0_2] : memref<784x128xf32, #tpu.memory_space<vmem>>, vector<784x128xf32>
    %cst = arith.constant dense<0.000000e+00> : vector<16x128xf32>
    %2 = tpu.matmul %0, %1, %cst {dimension_numbers = #tpu.dot_dimension_numbers<[1], [0], [0], [1], [0, 0, 1, 1], [], []>} : vector<16x784xf32>, vector<784x128xf32>, vector<16x128xf32> -> vector<16x128xf32>
    %c0_3 = arith.constant 0 : index
    %c0_4 = arith.constant 0 : index
    %3 = vector.load %arg3[%c0_3, %c0_4] : memref<1x128xf32, #tpu.memory_space<vmem>>, vector<1x128xf32>
    %4 = vector.broadcast %3 : vector<1x128xf32> to vector<16x128xf32>
    %5 = arith.addf %2, %4 : vector<16x128xf32>
    %cst_5 = arith.constant 0.000000e+00 : f32
    %6 = vector.broadcast %cst_5 : f32 to vector<16x128xf32>
    %7 = arith.maximumf %5, %6 : vector<16x128xf32>
    %c0_6 = arith.constant 0 : index
    %c0_7 = arith.constant 0 : index
    %8 = vector.load %arg4[%c0_6, %c0_7] : memref<128x128xf32, #tpu.memory_space<vmem>>, vector<128x128xf32>
    %cst_8 = arith.constant dense<0.000000e+00> : vector<16x128xf32>
    %9 = tpu.matmul %7, %8, %cst_8 {dimension_numbers = #tpu.dot_dimension_numbers<[1], [0], [0], [1], [0, 0, 1, 1], [], []>} : vector<16x128xf32>, vector<128x128xf32>, vector<16x128xf32> -> vector<16x128xf32>
    %c0_9 = arith.constant 0 : index
    %c0_10 = arith.constant 0 : index
    %10 = vector.load %arg5[%c0_9, %c0_10] : memref<1x128xf32, #tpu.memory_space<vmem>>, vector<1x128xf32>
    %11 = vector.broadcast %10 : vector<1x128xf32> to vector<16x128xf32>
    %12 = arith.addf %9, %11 : vector<16x128xf32>
    %c0_11 = arith.constant 0 : index
    %c0_12 = arith.constant 0 : index
    %13 = vector.load %arg6[%c0_11, %c0_12] : memref<16x128xf32, #tpu.memory_space<vmem>>, vector<16x128xf32>
    tpu.vector_store %arg6[%c0_11, %c0_12], %12 {strides = array<i32>} : memref<16x128xf32, #tpu.memory_space<vmem>>, vector<16x128xf32>,
    return
  }
  func.func @transform_0(%arg0: i32) -> (i32, i32) {
    %c0_i32 = arith.constant 0 : i32
    %c0_i32_0 = arith.constant 0 : i32
    return %arg0, %c0_i32 : i32, i32
  }
  func.func @transform_1(%arg0: i32) -> (i32, i32) {
    %c0_i32 = arith.constant 0 : i32
    %c0_i32_0 = arith.constant 0 : i32
    %c0_i32_1 = arith.constant 0 : i32
    return %c0_i32, %c0_i32_0 : i32, i32
  }
  func.func @transform_2(%arg0: i32) -> (i32, i32) {
    %c0_i32 = arith.constant 0 : i32
    %c0_i32_0 = arith.constant 0 : i32
    %c0_i32_1 = arith.constant 0 : i32
    return %c0_i32, %c0_i32_0 : i32, i32
  }
  func.func @transform_3(%arg0: i32) -> (i32, i32) {
    %c0_i32 = arith.constant 0 : i32
    %c0_i32_0 = arith.constant 0 : i32
    %c0_i32_1 = arith.constant 0 : i32
    return %c0_i32, %c0_i32_0 : i32, i32
  }
  func.func @transform_4(%arg0: i32) -> (i32, i32) {
    %c0_i32 = arith.constant 0 : i32
    %c0_i32_0 = arith.constant 0 : i32
    %c0_i32_1 = arith.constant 0 : i32
    return %c0_i32, %c0_i32_0 : i32, i32
  }
  func.func @transform_5(%arg0: i32) -> (i32, i32) {
    %c0_i32 = arith.constant 0 : i32
    %c0_i32_0 = arith.constant 0 : i32
    return %arg0, %c0_i32 : i32, i32
  }
}

</mosaic_0001>

<bundles_post_ra>
// kernel: tpu_custom_call.1
= control target key start
LH: loop header
LB: loop body
LE: loop exit
PB: predicated region body
PF: predicated region fallthrough
CT: control target
= control target key end

     0   :  { %10 = vsyncpa [#allocation3], 0  ;;  %s1804_s0 = inlined_call_operand.hbm [shape: f32[20,784], index: 0, kind: input, shape index: {}]   ;;  %s1805_s1 = inlined_call_operand.hbm [shape: f32[784,128], index: 1, kind: input, shape index: {}]   ;;  %s1806_s2 = inlined_call_operand.vmem [shape: f32[1,128], index: 2, kind: input, shape index: {}]   ;;  %s1807_s3 = inlined_call_operand.hbm [shape: f32[128,128], index: 3, kind: input, shape index: {}]   ;;  %s1808_s4 = inlined_call_operand.vmem [shape: f32[1,128], index: 4, kind: input, shape index: {}]   ;;  %s1809_s5 = inlined_call_operand.hbm [shape: f32[24,128], index: 5, kind: output, shape index: {}]  }
   0x1   :  { %12 = vsyncpa [#allocation3 + $0x1], 0 }
   0x2   :  { %13 = vsyncpa [#allocation6], 0 }
   0x3   :  { %14 = vsyncpa [#allocation4], 0 }
   0x4   :  { %16 = vsyncpa [#allocation4 + $0x1], 0  ;;  %s1536_s18 = smov 0   ;;  %s1538_s19 = smov 0  }
   0x5   :  { %s1540_s20 = smov 0   ;;  %s1542_s21 = smov 0  }
   0x6 LB: > { %s1557_s22 = sadd.s32 4294967295, %s1494_s21   ;;  %s931_s23 = sadd.s32 4294967294, %s1494_s21   ;;  %s1494_s21 = sphi %s1542_s21, %s1831_s21   ;;  %s1490_s20 = sphi %s1540_s20, %s1830_s20   ;;  %s1486_s19 = sphi %s1538_s19, %s1829_s19   ;;  %s1482_s18 = sphi %s1536_s18, %s1828_s18  }
   0x7   : > { %s1561_s24 = sadd.s32 1, %s1494_s21   ;;  %s29_s25 = sadd.s32 1, %s1490_s20 }
   0x8   : > { %s26_s26 = ssub.s32 %s1494_s21, %s1561_s24  ;;  %p36_p0 = scmp.ne.s32.totalorder %s1490_s20, %s1486_s19 }
   0x9   : > { %p27_p1 = scmp.eq.s32.totalorder %s26_s26, 0  ;;  %p37_p2 = scmp.eq.s32.totalorder %s1494_s21, 0 }
   0xa   : > { %p42_p3 = scmp.ne.s32.totalorder %s1486_s19, %s1482_s18  ;;  %p1810_p4 = scmp.eq.s32.totalorder %s1557_s22, 0 }
   0xb   : > { %s1573_s27 = scalar_select %p27_p1, %s1490_s20, %s29_s25  }
   0xc   : > { %p1575_p5 = por %p37_p2, %p36_p0  ;;  %p1581_p6 = por %p1810_p4, %p42_p3 }
   0xd   : > { %1813 = sst [smem:[#allocation12_spill]] %s1573_s27  ;;  %p150_p7 = scmp.eq.s32.totalorder %s1557_s22, 1 }
   0xe   : > { %s1814_s28 = scalar_select %p1575_p5, 1, 0 }
   0xf   : > { %s1815_s29 = scalar_select %p1581_p6, 1, 0 }
  0x10   : > { %p156_p8 = scmp.eq.s32.totalorder %s931_s23, 1  ;;  %p932_p9 = scmp.ge.s32.totalorder %s1494_s21, 1 }
  0x11   : > { %p163_p10 = scmp.lt.s32.totalorder %s1494_s21, 3  ;;  %p1588_p11 = por %p150_p7, %p36_p0 }
  0x12   : > { %p1592_p12 = por %p156_p8, %p42_p3  ;;  %s1496_s8 = smov [#allocation5]  }
  0x13   : > { %s1816_s30 = scalar_select %p1588_p11, 1, 0 }
  0x14   : > { %s1817_s6 = scalar_select %p1592_p12, 1, 0 }
  0x15   : > { %p1596_p13 = pnand %p932_p9, %p163_p10  ;;  %s175_s9 = sshll.u32 %s1496_s8, 4  ;;  %s176_s9 = int_to_ptr.vmem [resolvable:$true] %s175_s9 }
  0x16   : > { %s1497_s11 = smov [#allocation7]   ;;  %s1340_s15 = scalar_lea.hbm %s1805_s1, 12544 }
  0x17   : > { %s1818_s7 = scalar_select %p1596_p13, 1, 0 }
  0x18   : > { %p1284_p1 = pneg %p1596_p13  ;;  %s191_s12 = sshll.u32 %s1497_s11, 4  ;;  %s1608_s12 = int_to_ptr.vmem [resolvable:$true] %s191_s12 }
  0x19   : > { %p1341_p0 = scmp.ne.s32.totalorder %s1805_s1, %s1340_s15  ;;  %p1347_p9 = scmp.lt.u32.totalorder %s1340_s15, %s1805_s1 }
  0x1a   : > { %p1604_p2 = pnand %p1284_p1, %p1810_p4 }
  0x1c   : > { %p1342_p3 = pneg %p1604_p2 }
  0x1e   : > { %p1343_p7 = pnand %p1342_p3, %p1341_p0 }
  0x20   : > { %p1344_p8 = pneg %p1343_p7 }
  0x22   : > { %p1349_p10 = pnand %p1347_p9, %p1344_p8 }
  0x24   : > { %1352 = shalt.err (!%p1349_p10)
}
  0x25   : > { %s1353_s26 = scalar_lea.vmem %s176_s9, 12544  ;;  %p1361_p11 = scmp.lt.s32.totalorder %s176_s9, %s176_s9 }
  0x26   : > { %p1354_p1 = scmp.ne.s32.totalorder %s176_s9, %s1353_s26  ;;  %p1362_p6 = scmp.lt.s32.totalorder %s1353_s26, %s1353_s26 }
  0x28   : > { %p1356_p4 = pnand %p1354_p1, %p1342_p3  ;;  %p1363_p13 = por %p1362_p6, %p1361_p11 }
  0x2a   : > { %p1357_p12 = pneg %p1356_p4 }
  0x2c   : > { %p1364_p5 = pnand %p1363_p13, %p1357_p12 }
  0x2e   : > { %1367 = shalt.err (!%p1364_p5)
}
  0x2f   : > { %s1498_s8 = smov 128   ;;  %s1499_s11 = smov 8  }
  0x30   : > { %1287 = dma.hbm_to_vmem [thread:$0]  (!%p1604_p2), %s1805_s1, 12544, %s176_s9, [#allocation6], %s1498_s8, %s1498_s8, %s1499_s11  }
  0x31   : > { %s1368_s17 = scalar_lea.hbm %s1807_s3, 2048 }
  0x32   : > { %p1369_p4 = scmp.ne.s32.totalorder %s1807_s3, %s1368_s17  ;;  %p1375_p11 = scmp.lt.u32.totalorder %s1368_s17, %s1807_s3 }
  0x34   : > { %p1371_p5 = pnand %p1369_p4, %p1342_p3 }
  0x36   : > { %p1372_p6 = pneg %p1371_p5 }
  0x38   : > { %p1377_p12 = pnand %p1375_p11, %p1372_p6 }
  0x3a   : > { %1380 = shalt.err (!%p1377_p12)
}
  0x3b   : > { %s1381_s9 = scalar_lea.vmem %s1608_s12, 2048  ;;  %p1389_p8 = scmp.lt.s32.totalorder %s1608_s12, %s1608_s12 }
  0x3c   : > { %p1382_p13 = scmp.ne.s32.totalorder %s1608_s12, %s1381_s9  ;;  %p1390_p9 = scmp.lt.s32.totalorder %s1381_s9, %s1381_s9 }
  0x3e   : > { %p1384_p0 = pnand %p1382_p13, %p1342_p3  ;;  %p1391_p10 = por %p1390_p9, %p1389_p8 }
  0x40   : > { %p1385_p7 = pneg %p1384_p0 }
  0x42   : > { %p1392_p1 = pnand %p1391_p10, %p1385_p7 }
  0x44   : > { %1395 = shalt.err (!%p1392_p1)
}
  0x45   : > { %1290 = dma.hbm_to_vmem [thread:$0]  (!%p1604_p2), %s1807_s3, 2048, %s1608_s12, [#allocation6], %s1498_s8, %s1498_s8, %s1499_s11  }
  0x46   : > { %p935_p4 = scmp.ge.s32.totalorder %s1494_s21, 2 }
  0x47   : > { %p1820_p3 = scmp.ne.s32.totalorder (!%p935_p4), %s1814_s28, 0 }
  0x48   : > { %204 = sbr.rel (%p935_p4) target bundleno = 115 (0x73), region = 32 }
  0x4f   : > { %207 = sbr.rel (!%p1820_p3) target bundleno = 115 (0x73), region = 36  ;;  %s208_s14 = sand.u32 (%p1820_p3), 1, %s1490_s20  }
  0x50   : > { %s936_s15 = sshll.u32 (%p1820_p3), %s1494_s21, 1  ;;  %s1271_s16 = smul.u32 (%p1820_p3), 112, %s208_s14 }
  0x51   : > { %s214_s17 = ssub.s32 (%p1820_p3), 3, %s936_s15  ;;  %s1667_s8 = scalar_lea.sflag (%p1820_p3), [#allocation3], %s208_s14 }
  0x52   : > { %p215_p5 = scmp.lt.s32.totalorder (%p1820_p3), %s214_s17, 2  ;;  %s212_s11 = scalar_lea.vmem (%p1820_p3), [#allocation2], %s1271_s16 }
  0x56   : > { %s1833_s17 = smov (!%p215_p5, %s214_s17), 2 }
  0x57   : > { %s1664_s10 = smul.u32 896, %s1833_s17 }
  0x59   : > { %s220_s12 = ssub.s32 1792, %s1664_s10 }
  0x5a   : > { %221 = vsyncadd %s1667_s8, %s220_s12  ;;  %p939_p2 = scmp.ne.s32.totalorder %s1664_s10, 0  ;;  %s1272_s28 = smul.u32 1792, %s1494_s21 }
  0x5b   : > { %s227_s23 = sshll.u32 %s212_s11, 4  ;;  %s1400_s15 = scalar_lea.hbm %s1804_s0, 2688  ;;  %s1677_s23 = int_to_ptr.vmem [resolvable:$true] %s227_s23 }
  0x5c   : > { %s1675_s9 = scalar_lea.hbm %s1804_s0, %s1272_s28 }
  0x5d   : > { %s1396_s27 = scalar_lea.hbm %s1675_s9, %s1664_s10  ;;  %p1401_p13 = scmp.lt.u32.totalorder %s1675_s9, %s1804_s0 }
  0x5e   : > { %p1397_p6 = scmp.ne.s32.totalorder %s1675_s9, %s1396_s27  ;;  %p1402_p0 = scmp.lt.u32.totalorder %s1400_s15, %s1396_s27 }
  0x5f   : > { %p1404_p8 = scmp.lt.u32.totalorder %s1396_s27, %s1675_s9 }
  0x60   : > { %p1398_p11 = pnand %p1397_p6, %p939_p2  ;;  %p1403_p7 = por %p1402_p0, %p1401_p13 }
  0x62   : > { %p1399_p12 = pneg %p1398_p11  ;;  %p1405_p9 = por %p1404_p8, %p1403_p7 }
  0x64   : > { %p1406_p10 = pnand %p1405_p9, %p1399_p12 }
  0x66   : > { %1409 = shalt.err (!%p1406_p10)
}
  0x67   : > { %s1410_s12 = scalar_lea.vmem %s1677_s23, %s1664_s10  ;;  %s1500_s11 = smov [#allocation2]  }
  0x68   : > { %p1411_p1 = scmp.ne.s32.totalorder %s1677_s23, %s1410_s12  ;;  %s1414_s28 = sshll.u32 %s1500_s11, 4  ;;  %s1415_s28 = int_to_ptr.vmem [resolvable:$false] %s1414_s28 }
  0x69   : > { %s1416_s25 = scalar_lea.vmem %s1415_s28, 3584  ;;  %p1417_p6 = scmp.lt.s32.totalorder %s1677_s23, %s1415_s28 }
  0x6a   : > { %p1412_p3 = pnand %p1411_p1, %p939_p2  ;;  %p1418_p11 = scmp.lt.s32.totalorder %s1416_s25, %s1410_s12 }
  0x6c   : > { %p1413_p5 = pneg %p1412_p3  ;;  %p1419_p13 = por %p1418_p11, %p1417_p6 }
  0x6e   : > { %p1420_p0 = pnand %p1419_p13, %p1413_p5 }
  0x70   : > { %1423 = shalt.err (!%p1420_p0)
}
  0x71   : > { %s1501_s26 = smov 896   ;;  %s1502_s27 = smov 56  }
  0x72   : > { %233 = dma.hbm_to_vmem [thread:$0]  (%p939_p2), %s1675_s9, %s1664_s10, %s1677_s23, %s1667_s8, %s1501_s26, %s1501_s26, %s1502_s27  }
  0x73 PF: > { %p1821_p12 = scmp.ne.s32.totalorder %s1818_s7, 0 }
  0x74   : > { %s1707_s13 = sand.u32 (!%p1821_p12), 1, %s1486_s19   ;;  %p1822_p7 = scmp.ne.s32.totalorder (!%p1821_p12), %s1815_s29, 0 }
  0x75   : > { %239 = sbr.rel (%p1821_p12) target bundleno = 664 (0x298), region = 40  ;;  %s242_s15 = scalar_lea.sflag (!%p1821_p12), [#allocation3], %s1707_s13 }
  0x76   : > { %s1273_s14 = smul.u32 (!%p1821_p12), 112, %s1707_s13 }
  0x78   : > { %s1711_s16 = scalar_lea.vmem (!%p1821_p12), [#allocation2], %s1273_s14 }
  0x7c   : > { %1469 = dma.done.wait (%p1822_p7), %s242_s15, 1792  }
  0x7d   : > { %1471 = vsyncadd (%p1822_p7), %s242_s15, 4294965504  ;;  %p1823_p2 = scmp.eq.s32.totalorder %s1557_s22, 0 }
  0x7f   : > { %1473 = dma.done.wait (%p1823_p2), [#allocation6], 14592   ;;  %p1824_p8 = pmov %p1823_p2 }
  0x80   : > { %v321_v0 = vld [vmem:[#allocation5 + $0x80] sm:$0xff]  ;;  %v322_v1 = vld [vmem:[#allocation5 + $0x88] sm:$0xff]  ;;  %v323_v11 = vld [vmem:[#allocation5 + $0x90] sm:$0xff]  ;;  %vm410_vm0 = vcmask 130048   ;;  %s946_s10 = sshll.u32 %s1707_s13, 4  ;;  %s820_s17 = scalar_lea.sflag [#allocation4], %s1707_s13 }
  0x81   : > { %1475 = vsyncadd (%p1824_p8), [#allocation6], 4294952704  ;;  %v305_v2 = vld [vmem:[#allocation5] sm:$0xff]  ;;  %v1139_v3 = vpack.c.bf16 %v322_v1, %v321_v0  ;;  %v306_v4 = vld [vmem:[#allocation5 + $0x8] sm:$0xff]  ;;  %s279_s9 = scalar_lea.vmem [#allocation8], %s946_s10  ;;  %p1825_p9 = scmp.ne.s32.totalorder %s1816_s30, 0 }
  0x82   : > { %v353_v5 = vld [vmem:[#allocation5 + $0x180] sm:$0xff]  ;;  %v354_v6 = vld [vmem:[#allocation5 + $0x188] sm:$0xff]  ;;  %v1141_v7 = vpack.c.bf16 %v306_v4, %v305_v2  ;;  %v324_v13 = vld [vmem:[#allocation5 + $0x98] sm:$0xff]  ;;  %s952_s12 = sshll.u32 (%p1825_p9), %s1557_s22, 1 }
  0x83   : > { %v1171_v8 = vpack.c.bf16 %v354_v6, %v353_v5  ;;  %v337_v9 = vld [vmem:[#allocation5 + $0x100] sm:$0xff]  ;;  %v338_v10 = vld [vmem:[#allocation5 + $0x108] sm:$0xff]  ;;  %1140 = vmatprep.subr.bf16.mxu0 %v1139_v3  ;;  %v307_v14 = vld [vmem:[#allocation5 + $0x10] sm:$0xff]  ;;  %v1143_v16 = vpack.c.bf16 %v324_v13, %v323_v11  ;;  %s828_s11 = ssub.s32 (%p1825_p9), 3, %s952_s12 }
  0x84   : > { %v1173_v12 = vpack.c.bf16 %v338_v10, %v337_v9  ;;  %v308_v15 = vld [vmem:[#allocation5 + $0x18] sm:$0xff]  ;;  %1142 = vmatpush3.bf16.msra.mxu0 %v1141_v7  ;;  %v355_v18 = vld [vmem:[#allocation5 + $0x190] sm:$0xff]  ;;  %v325_v23 = vld [vmem:[#allocation5 + $0xa0] sm:$0xff]  ;;  %p829_p10 = scmp.lt.s32.totalorder (%p1825_p9), %s828_s11, 2 }
  0x85   : > { %1172 = vmatprep.subr.bf16.mxu1 %v1171_v8  ;;  %v1145_v17 = vpack.c.bf16 %v308_v15, %v307_v14  ;;  %v356_v19 = vld [vmem:[#allocation5 + $0x198] sm:$0xff]  ;;  %v339_v20 = vld [vmem:[#allocation5 + $0x110] sm:$0xff]  ;;  %v326_v24 = vld [vmem:[#allocation5 + $0xa8] sm:$0xff]  ;;  %1144 = vmatprep.subr.bf16.mxu0 %v1143_v16 }
  0x86   : > { %1174 = vmatpush3.bf16.msra.mxu1 %v1173_v12  ;;  %v1175_v21 = vpack.c.bf16 %v356_v19, %v355_v18  ;;  %v340_v22 = vld [vmem:[#allocation5 + $0x118] sm:$0xff]  ;;  %v1147_v26 = vpack.c.bf16 %v326_v24, %v325_v23  ;;  %v309_v27 = vld [vmem:[#allocation5 + $0x20] sm:$0xff]  ;;  %v310_v28 = vld [vmem:[#allocation5 + $0x28] sm:$0xff] }
  0x87   : > { %v1177_v25 = vpack.c.bf16 %v340_v22, %v339_v20  ;;  %v357_v29 = vld [vmem:[#allocation5 + $0x1a0] sm:$0xff]  ;;  %v358_v30 = vld [vmem:[#allocation5 + $0x1a8] sm:$0xff]  ;;  %v1149_v33 = vpack.c.bf16 %v310_v28, %v309_v27  ;;  %v327_v35 = vld [vmem:[#allocation5 + $0xb0] sm:$0xff] }
  0x88   : > { %1176 = vmatprep.subr.bf16.mxu1 %v1175_v21  ;;  %v341_v31 = vld [vmem:[#allocation5 + $0x120] sm:$0xff]  ;;  %v342_v32 = vld [vmem:[#allocation5 + $0x128] sm:$0xff]  ;;  %1146 = vmatpush3.bf16.msra.mxu0 %v1145_v17  ;;  %v1179_v34 = vpack.c.bf16 %v358_v30, %v357_v29  ;;  %v328_v36 = vld [vmem:[#allocation5 + $0xb8] sm:$0xff] }
  0x89   : > { %v311_v37 = vld [vmem:[#allocation5 + $0x30] sm:$0xff]  ;;  %1148 = vmatprep.subr.bf16.mxu0 %v1147_v26  ;;  %v1181_v38 = vpack.c.bf16 %v342_v32, %v341_v31  ;;  %v1151_v39 = vpack.c.bf16 %v328_v36, %v327_v35  ;;  %v312_v40 = vld [vmem:[#allocation5 + $0x38] sm:$0xff]  ;;  %v329_v46 = vld [vmem:[#allocation5 + $0xc0] sm:$0xff] }
  0x8a   : > { %1178 = vmatpush3.bf16.msra.mxu1 %v1177_v25  ;;  %v359_v41 = vld [vmem:[#allocation5 + $0x1b0] sm:$0xff]  ;;  %v360_v42 = vld [vmem:[#allocation5 + $0x1b8] sm:$0xff]  ;;  %v330_v47 = vld [vmem:[#allocation5 + $0xc8] sm:$0xff]  ;;  %v1153_v48 = vpack.c.bf16 %v312_v40, %v311_v37 }
  0x8b   : > { %1180 = vmatprep.subr.bf16.mxu1 %v1179_v34  ;;  %v1183_v43 = vpack.c.bf16 %v360_v42, %v359_v41  ;;  %v343_v44 = vld [vmem:[#allocation5 + $0x130] sm:$0xff]  ;;  %v344_v45 = vld [vmem:[#allocation5 + $0x138] sm:$0xff]  ;;  %v361_v49 = vld [vmem:[#allocation5 + $0x1c0] sm:$0xff]  ;;  %v1155_v52 = vpack.c.bf16 %v330_v47, %v329_v46 }
  0x8c   : > { %1150 = vmatpush3.bf16.msra.mxu0 %v1149_v33  ;;  %v362_v50 = vld [vmem:[#allocation5 + $0x1c8] sm:$0xff]  ;;  %v1185_v51 = vpack.c.bf16 %v344_v45, %v343_v44  ;;  %v313_v53 = vld [vmem:[#allocation5 + $0x40] sm:$0xff]  ;;  %v331_v58 = vld [vmem:[#allocation5 + $0xd0] sm:$0xff] }
  0x8d   : > { %1152 = vmatprep.subr.bf16.mxu0 %v1151_v39  ;;  %v314_v54 = vld [vmem:[#allocation5 + $0x48] sm:$0xff]  ;;  %v345_v55 = vld [vmem:[#allocation5 + $0x140] sm:$0xff]  ;;  %v1187_v56 = vpack.c.bf16 %v362_v50, %v361_v49  ;;  %v332_v59 = vld [vmem:[#allocation5 + $0xd8] sm:$0xff] }
  0x8e   : > { %1182 = vmatpush3.bf16.msra.mxu1 %v1181_v38  ;;  %v346_v57 = vld [vmem:[#allocation5 + $0x148] sm:$0xff]  ;;  %v363_v60 = vld [vmem:[#allocation5 + $0x1d0] sm:$0xff]  ;;  %v364_v61 = vld [vmem:[#allocation5 + $0x1d8] sm:$0xff]  ;;  %v1157_v62 = vpack.c.bf16 %v314_v54, %v313_v53  ;;  %v1159_v0 = vpack.c.bf16 %v332_v59, %v331_v58 }
  0x8f   : > { %1184 = vmatprep.subr.bf16.mxu1 %v1183_v43  ;;  %v1189_v63 = vpack.c.bf16 %v346_v57, %v345_v55  ;;  %v315_v1 = vld [vmem:[#allocation5 + $0x50] sm:$0xff]  ;;  %v316_v2 = vld [vmem:[#allocation5 + $0x58] sm:$0xff]  ;;  %v1191_v4 = vpack.c.bf16 %v364_v61, %v363_v60  ;;  %v333_v6 = vld [vmem:[#allocation5 + $0xe0] sm:$0xff] }
  0x90   : > { %1154 = vmatpush3.bf16.msra.mxu0 %v1153_v48  ;;  %v347_v3 = vld [vmem:[#allocation5 + $0x150] sm:$0xff]  ;;  %v348_v5 = vld [vmem:[#allocation5 + $0x158] sm:$0xff]  ;;  %v334_v7 = vld [vmem:[#allocation5 + $0xe8] sm:$0xff]  ;;  %v1161_v10 = vpack.c.bf16 %v316_v2, %v315_v1 }
  0x91   : > { %1156 = vmatprep.subr.bf16.mxu0 %v1155_v52  ;;  %v365_v8 = vld [vmem:[#allocation5 + $0x1e0] sm:$0xff]  ;;  %v366_v9 = vld [vmem:[#allocation5 + $0x1e8] sm:$0xff]  ;;  %v1193_v13 = vpack.c.bf16 %v348_v5, %v347_v3  ;;  %v1163_v14 = vpack.c.bf16 %v334_v7, %v333_v6  ;;  %v335_v19 = vld [vmem:[#allocation5 + $0xf0] sm:$0xff] }
  0x92   : > { %1186 = vmatpush3.bf16.msra.mxu1 %v1185_v51  ;;  %v317_v11 = vld [vmem:[#allocation5 + $0x60] sm:$0xff]  ;;  %v292_v12 = vld [vmem:[%s1711_s16 + $0x8] sm:$0xff]  ;;  %v1195_v18 = vpack.c.bf16 %v366_v9, %v365_v8  ;;  %v294_v21 = vld [vmem:[%s1711_s16 + $0x18] sm:$0xff] }
  0x93   : > { %1188 = vmatprep.subr.bf16.mxu1 %v1187_v56  ;;  %v318_v15 = vld [vmem:[#allocation5 + $0x68] sm:$0xff]  ;;  %v349_v16 = vld [vmem:[#allocation5 + $0x160] sm:$0xff]  ;;  %v336_v20 = vld [vmem:[#allocation5 + $0xf8] sm:$0xff]  ;;  %481 = vmatprep.mubr.f32.mxu0 %v292_v12 }
  0x94   : > { %1158 = vmatpush3.bf16.msra.mxu0 %v1157_v62  ;;  %v350_v17 = vld [vmem:[#allocation5 + $0x168] sm:$0xff]  ;;  %v367_v22 = vld [vmem:[#allocation5 + $0x1f0] sm:$0xff]  ;;  %v368_v23 = vld [vmem:[#allocation5 + $0x1f8] sm:$0xff]  ;;  %556 = vmatprep.mubr.f32.mxu1 %v294_v21  ;;  %v1165_v24 = vpack.c.bf16 %v318_v15, %v317_v11  ;;  %v1167_v26 = vpack.c.bf16 %v336_v20, %v335_v19 }
  0x95   : > { %1160 = vmatprep.subr.bf16.mxu0 %v1159_v0  ;;  %v1197_v25 = vpack.c.bf16 %v350_v17, %v349_v16  ;;  %v319_v27 = vld [vmem:[#allocation5 + $0x70] sm:$0xff]  ;;  %v320_v28 = vld [vmem:[#allocation5 + $0x78] sm:$0xff]  ;;  %v1199_v30 = vpack.c.bf16 %v368_v23, %v367_v22  ;;  %v385_v32 = vld [vmem:[#allocation5 + $0x280] sm:$0xff] }
  0x96   : > { %1190 = vmatpush3.bf16.msra.mxu1 %v1189_v63  ;;  %v351_v29 = vld [vmem:[#allocation5 + $0x170] sm:$0xff]  ;;  %v352_v31 = vld [vmem:[#allocation5 + $0x178] sm:$0xff]  ;;  %v386_v33 = vld [vmem:[#allocation5 + $0x288] sm:$0xff]  ;;  %v1169_v34 = vpack.c.bf16 %v320_v28, %v319_v27 }
  0x97   : > { %1192 = vmatprep.subr.bf16.mxu1 %v1191_v4  ;;  %v1201_v35 = vpack.c.bf16 %v352_v31, %v351_v29  ;;  %v1203_v36 = vpack.c.bf16 %v386_v33, %v385_v32  ;;  %v369_v37 = vld [vmem:[#allocation5 + $0x200] sm:$0xff]  ;;  %v370_v38 = vld [vmem:[#allocation5 + $0x208] sm:$0xff]  ;;  %v387_v39 = vld [vmem:[#allocation5 + $0x290] sm:$0xff] }
  0x98   : > { %1162 = vmatpush3.bf16.msra.mxu0 %v1161_v10  ;;  %v388_v40 = vld [vmem:[#allocation5 + $0x298] sm:$0xff]  ;;  %v291_v41 = vld [vmem:[%s1711_s16] sm:$0xff]  ;;  %v1205_v42 = vpack.c.bf16 %v370_v38, %v369_v37  ;;  %v293_v43 = vld [vmem:[%s1711_s16 + $0x10] sm:$0xff] }
  0x99   : > { %1164 = vmatprep.subr.bf16.mxu0 %v1163_v14  ;;  %v1207_v44 = vpack.c.bf16 %v388_v40, %v387_v39  ;;  %v371_v45 = vld [vmem:[#allocation5 + $0x210] sm:$0xff]  ;;  %v372_v46 = vld [vmem:[#allocation5 + $0x218] sm:$0xff]  ;;  %v389_v47 = vld [vmem:[#allocation5 + $0x2a0] sm:$0xff] }
  0x9a   : > { %1194 = vmatpush3.bf16.msra.mxu1 %v1193_v13  ;;  %v390_v48 = vld [vmem:[#allocation5 + $0x2a8] sm:$0xff]  ;;  %v299_v49 = vld [vmem:[%s1711_s16 + $0x40] sm:$0xff]  ;;  %v301_v51 = vld [vmem:[%s1711_s16 + $0x50] sm:$0xff]  ;;  %v1209_v53 = vpack.c.bf16 %v372_v46, %v371_v45 }
  0x9b   : > { %1196 = vmatprep.subr.bf16.mxu1 %v1195_v18  ;;  %v401_v50 = vld [vmem:[#allocation5 + $0x300] sm:$0xff]  ;;  %v402_v52 = vld [vmem:[#allocation5 + $0x308] sm:$0xff]  ;;  %v1211_v56 = vpack.c.bf16 %v390_v48, %v389_v47  ;;  %v391_v60 = vld [vmem:[#allocation5 + $0x2b0] sm:$0xff] }
  0x9c   : > { %1166 = vmatpush3.bf16.msra.mxu0 %v1165_v24  ;;  %v298_v54 = vld [vmem:[%s1711_s16 + $0x38] sm:$0xff]  ;;  %v1235_v55 = vpack.c.bf16 %v402_v52, %v401_v50  ;;  %v373_v57 = vld [vmem:[#allocation5 + $0x220] sm:$0xff]  ;;  %v300_v59 = vld [vmem:[%s1711_s16 + $0x48] sm:$0xff] }
  0x9d   : > { %1168 = vmatprep.subr.bf16.mxu0 %v1167_v26  ;;  %v374_v58 = vld [vmem:[#allocation5 + $0x228] sm:$0xff]  ;;  %v392_v61 = vld [vmem:[#allocation5 + $0x2b8] sm:$0xff]  ;;  %v297_v63 = vld [vmem:[%s1711_s16 + $0x30] sm:$0xff] }
  0x9e   : > { %1198 = vmatpush3.bf16.msra.mxu1 %v1197_v25  ;;  %v296_v62 = vld [vmem:[%s1711_s16 + $0x28] sm:$0xff]  ;;  %v1213_v0 = vpack.c.bf16 %v374_v58, %v373_v57  ;;  %v1215_v1 = vpack.c.bf16 %v392_v61, %v391_v60  ;;  %v375_v2 = vld [vmem:[#allocation5 + $0x230] sm:$0xff]  ;;  %v393_v5 = vld [vmem:[#allocation5 + $0x2c0] sm:$0xff] }
  0x9f   : > { %1200 = vmatprep.subr.bf16.mxu1 %v1199_v30  ;;  %v376_v3 = vld [vmem:[#allocation5 + $0x238] sm:$0xff]  ;;  %v394_v6 = vld [vmem:[#allocation5 + $0x2c8] sm:$0xff]  ;;  %v377_v9 = vld [vmem:[#allocation5 + $0x240] sm:$0xff] }
  0xa0   : > { %1170 = vmatpush3.bf16.msra.mxu0 %v1169_v34  ;;  %v304_v4 = vld [vmem:[%s1711_s16 + $0x68] sm:$0xff]  ;;  %v1217_v7 = vpack.c.bf16 %v376_v3, %v375_v2  ;;  %v1219_v8 = vpack.c.bf16 %v394_v6, %v393_v5  ;;  %v395_v11 = vld [vmem:[#allocation5 + $0x2d0] sm:$0xff]  ;;  %v397_v17 = vld [vmem:[#allocation5 + $0x2e0] sm:$0xff] }
  0xa1   : > { %1204 = vmatprep.subr.bf16.mxu0 %v1203_v36  ;;  %v378_v10 = vld [vmem:[#allocation5 + $0x248] sm:$0xff]  ;;  %v396_v12 = vld [vmem:[#allocation5 + $0x2d8] sm:$0xff]  ;;  %v379_v15 = vld [vmem:[#allocation5 + $0x250] sm:$0xff] }
  0xa2   : > { %1202 = vmatpush3.bf16.msra.mxu1 %v1201_v35  ;;  %v1221_v13 = vpack.c.bf16 %v378_v10, %v377_v9  ;;  %v1223_v14 = vpack.c.bf16 %v396_v12, %v395_v11  ;;  %v380_v16 = vld [vmem:[#allocation5 + $0x258] sm:$0xff]  ;;  %v398_v18 = vld [vmem:[#allocation5 + $0x2e8] sm:$0xff]  ;;  %v381_v21 = vld [vmem:[#allocation5 + $0x260] sm:$0xff] }
  0xa3   : > { %482 = vmatmul.mubr.f32.vlgmr.msra.gmra.mrb[0].mxu0 %v291_v41  ;;  %1236 = vmatprep.subr.bf16.mxu1 %v1235_v55  ;;  %v1225_v19 = vpack.c.bf16 %v380_v16, %v379_v15  ;;  %v1227_v20 = vpack.c.bf16 %v398_v18, %v397_v17  ;;  %v382_v22 = vld [vmem:[#allocation5 + $0x268] sm:$0xff]  ;;  %v399_v23 = vld [vmem:[#allocation5 + $0x2f0] sm:$0xff]  ;;  %v400_v24 = vld [vmem:[#allocation5 + $0x2f8] sm:$0xff] }
  0xa4   : > { %1206 = vmatpush3.bf16.msra.mxu0 %v1205_v42  ;;  %486 = vmatprep.mubr.f32.mxu0 %v299_v49  ;;  %v1229_v25 = vpack.c.bf16 %v382_v22, %v381_v21  ;;  %v1231_v26 = vpack.c.bf16 %v400_v24, %v399_v23  ;;  %v383_v27 = vld [vmem:[#allocation5 + $0x270] sm:$0xff]  ;;  %v384_v28 = vld [vmem:[#allocation5 + $0x278] sm:$0xff]  ;;  %v721_v35 = vld [vmem:[#allocation7 + $0x10] sm:$0xff] }
  0xa5   : > { %557 = vmatmul.mubr.f32.vlgmr.msra.gmra.mrb[0].mxu1 %v293_v43  ;;  %1208 = vmatprep.subr.bf16.mxu0 %v1207_v44  ;;  %v1233_v29 = vpack.c.bf16 %v384_v28, %v383_v27  ;;  %v295_v30 = vld [vmem:[%s1711_s16 + $0x20] sm:$0xff]  ;;  %v302_v32 = vld [vmem:[%s1711_s16 + $0x58] sm:$0xff] }
  0xa6   : > { %561 = vmatprep.mubr.f32.mxu1 %v301_v51  ;;  %1238 = vmatpush3.bf16.msra.mxu1 %v1235_v55  ;;  %v303_v31 = vld [vmem:[%s1711_s16 + $0x60] sm:$0xff]  ;;  %v720_v34 = vld [vmem:[#allocation7 + $0x8] sm:$0xff]  ;;  %v722_v37 = vld [vmem:[#allocation7 + $0x18] sm:$0xff] }
  0xa7   : > { %487 = vmatmul.mubr.f32.gmra.mrb[2].mxu0 %v298_v54  ;;  %v719_v33 = vld [vmem:[#allocation7] sm:$0xff]  ;;  %v1243_v38 = vpack.c.bf16 %v722_v37, %v721_v35  ;;  %v724_v40 = vld [vmem:[#allocation7 + $0x28] sm:$0xff]  ;;  %v725_v42 = vld [vmem:[#allocation7 + $0x30] sm:$0xff] }
  0xa8   : > { %1210 = vmatpush3.bf16.msra.mxu0 %v1209_v53  ;;  %631 = vmatprep.mubr.f32.mxu0 %v296_v62  ;;  %v1239_v36 = vpack.c.bf16 %v720_v34, %v719_v33  ;;  %v723_v39 = vld [vmem:[#allocation7 + $0x20] sm:$0xff]  ;;  %v726_v43 = vld [vmem:[#allocation7 + $0x38] sm:$0xff]  ;;  %v728_v46 = vld [vmem:[#allocation7 + $0x48] sm:$0xff] }
  0xa9   : > { %562 = vmatmul.mubr.f32.gmra.mrb[2].mxu1 %v300_v59  ;;  %1212 = vmatprep.subr.bf16.mxu0 %v1211_v56  ;;  %v1247_v41 = vpack.c.bf16 %v724_v40, %v723_v39  ;;  %v1251_v44 = vpack.c.bf16 %v726_v43, %v725_v42  ;;  %v727_v45 = vld [vmem:[#allocation7 + $0x40] sm:$0xff]  ;;  %v729_v48 = vld [vmem:[#allocation7 + $0x50] sm:$0xff]  ;;  %v730_v49 = vld [vmem:[#allocation7 + $0x58] sm:$0xff] }
  0xaa   : > { %1101 = vmatprep.mubr.msk.f32.mxu1 %vm410_vm0, %v297_v63  ;;  %1240 = vmatprep.subr.bf16.mxu1 %v1239_v36  ;;  %v1255_v47 = vpack.c.bf16 %v728_v46, %v727_v45  ;;  %v1259_v50 = vpack.c.bf16 %v730_v49, %v729_v48  ;;  %v731_v51 = vld [vmem:[#allocation7 + $0x60] sm:$0xff]  ;;  %v732_v52 = vld [vmem:[#allocation7 + $0x68] sm:$0xff]  ;;  %v733_v54 = vld [vmem:[#allocation7 + $0x70] sm:$0xff] }
  0xab   : > { %v1263_v53 = vpack.c.bf16 %v732_v52, %v731_v51  ;;  %v734_v55 = vld [vmem:[#allocation7 + $0x78] sm:$0xff]  ;;  %v947_v58 = vld [vmem:[%s1806_s2] ss:$0 sm:$0xff] }
  0xac   : > { %1214 = vmatpush3.bf16.msra.mxu0 %v1213_v0  ;;  %v1267_v56 = vpack.c.bf16 %v734_v55, %v733_v54  ;;  %v950_v24 = vld [vmem:[%s1808_s4] ss:$0 sm:$0xff] }
  0xad   : > { %1102 = vmatmul.mubr.msk.f32.vlgmr.msra.gmra.mrb[4].mxu1 %vm410_vm0, %v304_v4  ;;  %1216 = vmatprep.subr.bf16.mxu0 %v1215_v1 }
  0xae   : > { %1242 = vmatpush3.bf16.msra.mxu1 %v1239_v36 }
  0xaf   : > { %1244 = vmatprep.subr.bf16.mxu1 %v1243_v38 }
  0xb0   : > { %1218 = vmatpush3.bf16.msra.mxu0 %v1217_v7 }
  0xb1   : > { %1220 = vmatprep.subr.bf16.mxu0 %v1219_v8 }
  0xb2   : > { %1246 = vmatpush3.bf16.msra.mxu1 %v1243_v38 }
  0xb3   : > { %1248 = vmatprep.subr.bf16.mxu1 %v1247_v41 }
  0xb4   : > { %1222 = vmatpush3.bf16.msra.mxu0 %v1221_v13 }
  0xb5   : > { %1224 = vmatprep.subr.bf16.mxu0 %v1223_v14 }
  0xb6   : > { %1250 = vmatpush3.bf16.msra.mxu1 %v1247_v41 }
  0xb7   : > { %1252 = vmatprep.subr.bf16.mxu1 %v1251_v44 }
  0xb8   : > { %1226 = vmatpush3.bf16.msra.mxu0 %v1225_v19 }
  0xb9   : > { %1228 = vmatprep.subr.bf16.mxu0 %v1227_v20 }
  0xba   : > { %1254 = vmatpush3.bf16.msra.mxu1 %v1251_v44 }
  0xbb   : > { %1256 = vmatprep.subr.bf16.mxu1 %v1255_v47 }
  0xbc   : > { %1230 = vmatpush3.bf16.msra.mxu0 %v1229_v25 }
  0xbd   : > { %1232 = vmatprep.subr.bf16.mxu0 %v1231_v26 }
  0xbe   : > { %1258 = vmatpush3.bf16.msra.mxu1 %v1255_v47 }
  0xbf   : > { %1260 = vmatprep.subr.bf16.mxu1 %v1259_v50 }
  0xc0   : > { %1234 = vmatpush3.bf16.msra.mxu0 %v1233_v29 }
  0xc2   : > { %1262 = vmatpush3.bf16.msra.mxu1 %v1259_v50 }
  0xc3   : > { %632 = vmatmul.mubr.f32.vlgmr.msra.gmra.mrb[4].mxu0 %v295_v30  ;;  %1264 = vmatprep.subr.bf16.mxu1 %v1263_v53 }
  0xc4   : > { %636 = vmatprep.mubr.f32.mxu0 %v303_v31 }
  0xc6   : > { %1266 = vmatpush3.bf16.msra.mxu1 %v1263_v53 }
  0xc7   : > { %637 = vmatmul.mubr.f32.gmra.mrb[6].mxu0 %v302_v32  ;;  %1268 = vmatprep.subr.bf16.mxu1 %v1267_v56 }
  0xca   : > { %1270 = vmatpush3.bf16.msra.mxu1 %v1267_v56 }
 0x176   : > { %v993_v57 = vpop.f32.mrb[0].mxu0 }
 0x177   : > { %v994_v59 = vpop.f32.mrb[1].mxu0 }
 0x178   : > { %v1031_v60 = vpop.f32.mrb[0].mxu1  ;;  %v995_v61 = vadd.f32 %v994_v59, %v993_v57 }
 0x179   : > { %v1032_v62 = vpop.f32.mrb[1].mxu1 }
 0x17a   : > { %v1033_v63 = vadd.f32 %v1032_v62, %v1031_v60  ;;  %v484_v0 = vadd.f32 %v995_v61, %v947_v58  ;;  %v996_v1 = vpop.f32.mrb[2].mxu0 }
 0x17b   : > { %v997_v2 = vpop.f32.mrb[3].mxu0 }
 0x17c   : > { %v1034_v3 = vpop.f32.mrb[2].mxu1  ;;  %v559_v4 = vadd.f32 %v1033_v63, %v484_v0  ;;  %v998_v5 = vadd.f32 %v997_v2, %v996_v1 }
 0x17d   : > { %v1035_v6 = vpop.f32.mrb[3].mxu1 }
 0x17e   : > { %v1036_v7 = vadd.f32 %v1035_v6, %v1034_v3  ;;  %v489_v8 = vadd.f32 %v998_v5, %v947_v58 }
 0x180   : > { %v1103_v9 = vpop.f32.mrb[4].mxu1  ;;  %v564_v10 = vadd.f32 %v1036_v7, %v489_v8 }
 0x181   : > { %v708_v11 = vpop.f32.mrb[5].mxu1 }
 0x196   : > { %v1069_v12 = vpop.f32.mrb[4].mxu0 }
 0x197   : > { %v1070_v13 = vpop.f32.mrb[5].mxu0 }
 0x198   : > { %v1071_v14 = vadd.f32 %v1070_v13, %v1069_v12 }
 0x19a   : > { %v1072_v15 = vpop.f32.mrb[6].mxu0  ;;  %v634_v16 = vadd.f32 %v1071_v14, %v559_v4 }
 0x19b   : > { %v1073_v17 = vpop.f32.mrb[7].mxu0 }
 0x19c   : > { %v1074_v18 = vadd.f32 %v1073_v17, %v1072_v15  ;;  %v709_v19 = vadd.f32 %v708_v11, %v634_v16 }
 0x19e   : > { %v639_v20 = vadd.f32 %v1074_v18, %v564_v10  ;;  %v717_v21 = vmax.f32 %v709_v19, 0.0 }
 0x1a0   : > { %v714_v22 = vadd.f32 %v1103_v9, %v639_v20  ;;  %1136 = vmatprep.mubr.f32.mxu1 %v717_v21 }
 0x1a2   : > { %v718_v23 = vmax.f32 %v714_v22, 0.0 }
 0x1a4   : > { %1137 = vmatmul.mubr.f32.vlgmr.msra.gmra.mrb[6].mxu1 %v718_v23 }
 0x275   : > { %826 = sbr.rel (!%p1825_p9) target bundleno = 664 (0x298), region = 56 }
 0x277   : > { %v1138_v25 = vpop.f32.mrb[6].mxu1 }
 0x278   : > { %v814_v26 = vadd.f32 %v1138_v25, %v950_v24  ;;  %v808_v27 = vpop.f32.mrb[7].mxu1 }
 0x279   : > { %v809_v28 = vadd.f32 %v950_v24, %v808_v27 }
 0x27a   : > { %818 = vst [vmem:[%s279_s9 + $0x8] sm:$0xff] %v814_v26 }
 0x27b   : > { %817 = vst [vmem:[%s279_s9] sm:$0xff] %v809_v28 }
 0x27c   : > { %s1835_s11 = smov (!%p829_p10, %s828_s11), 2 }
 0x27d   : > { %s1746_s28 = sshll.u32 %s1835_s11, 7 }
 0x27e   : > { %s833_s25 = ssub.s32 256, %s1746_s28 }
 0x27f   : > { %834 = vsyncadd %s820_s17, %s833_s25  ;;  %p954_p1 = scmp.ne.s32.totalorder %s1746_s28, 0  ;;  %s960_s26 = sshll.u32 %s1557_s22, 8 }
 0x280   : > { %s1756_s14 = scalar_lea.hbm %s1809_s5, %s960_s26  ;;  %s839_s15 = sshll.u32 %s279_s9, 4  ;;  %s1758_s15 = int_to_ptr.vmem [resolvable:$true] %s839_s15 }
 0x281   : > { %s1424_s16 = scalar_lea.vmem %s1758_s15, %s1746_s28  ;;  %s1503_s29 = smov [#allocation8]  }
 0x282   : > { %p1425_p3 = scmp.ne.s32.totalorder %s1758_s15, %s1424_s16  ;;  %s1428_s7 = sshll.u32 %s1503_s29, 4  ;;  %s1429_s7 = int_to_ptr.vmem [resolvable:$false] %s1428_s7 }
 0x283   : > { %s1430_s22 = scalar_lea.vmem %s1429_s7, 512  ;;  %p1431_p11 = scmp.lt.s32.totalorder %s1758_s15, %s1429_s7 }
 0x284   : > { %p1426_p5 = pnand %p1425_p3, %p954_p1  ;;  %p1432_p13 = scmp.lt.s32.totalorder %s1430_s22, %s1424_s16 }
 0x286   : > { %p1427_p6 = pneg %p1426_p5  ;;  %p1433_p0 = por %p1432_p13, %p1431_p11 }
 0x288   : > { %p1434_p12 = pnand %p1433_p0, %p1427_p6 }
 0x28a   : > { %1437 = shalt.err (!%p1434_p12)
}
 0x28b   : > { %s1438_s10 = scalar_lea.hbm %s1756_s14, %s1746_s28  ;;  %s1442_s9 = scalar_lea.hbm %s1809_s5, 384 }
 0x28c   : > { %p1439_p7 = scmp.ne.s32.totalorder %s1756_s14, %s1438_s10  ;;  %p1443_p9 = scmp.lt.u32.totalorder %s1756_s14, %s1809_s5 }
 0x28d   : > { %p1444_p10 = scmp.lt.u32.totalorder %s1442_s9, %s1438_s10  ;;  %p1446_p5 = scmp.lt.u32.totalorder %s1438_s10, %s1756_s14 }
 0x28e   : > { %p1440_p2 = pnand %p1439_p7, %p954_p1 }
 0x28f   : > { %p1445_p3 = por %p1444_p10, %p1443_p9 }
 0x290   : > { %p1441_p8 = pneg %p1440_p2 }
 0x291   : > { %p1447_p6 = por %p1446_p5, %p1445_p3 }
 0x293   : > { %p1448_p11 = pnand %p1447_p6, %p1441_p8 }
 0x295   : > { %1451 = shalt.err (!%p1448_p11)
}
 0x296   : > { %s1504_s25 = smov 128   ;;  %s1505_s26 = smov 8  }
 0x297   : > { %845 = dma.vmem_to_hbm [thread:$0]  (%p954_p1), %s1758_s15, %s1746_s28, %s1756_s14, %s820_s17, %s1504_s25, %s1504_s25, %s1505_s26  }
 0x298 PF: > { %s854_s30 = sand.u32 1, %s1482_s18   ;;  %p1826_p13 = scmp.ne.s32.totalorder %s1817_s6, 0 }
 0x299   : > { %s855_s27 = scalar_lea.sflag [#allocation4], %s854_s30 }
 0x29a   : > { %p1292_p0 = pnand %p935_p4, %p1826_p13 }
 0x29c   : > { %1477 = dma.done.wait (!%p1292_p0), %s855_s27, 256  }
 0x29d   : > { %1479 = vsyncadd (!%p1292_p0), %s855_s27, 4294967040  ;;  %s1827_s16 = sld [smem:[#allocation12_spill]]  ;;  %p19_p12 = scmp.ge.s32.totalorder %s1561_s24, 4  }
 0x29e   : > { %s1828_s18 = smov %s1486_s19  ;;  %s1829_s19 = smov %s1490_s20 }
 0x29f   : > { %s1831_s21 = smov %s1561_s24  ;;  %21 = sbr.rel (!%p19_p12) target bundleno = 6 (0x6), region = 93 }
 0x2a3   : > { %s1830_s20 = smov %s1827_s16 }
 0x2a6   :  { %860 = vsyncpa [#allocation3], 1 }
 0x2a7   :  { %862 = vsyncpa [#allocation3 + $0x1], 1 }
 0x2a8   :  { %863 = vsyncpa [#allocation6], 1 }
 0x2a9   :  { %864 = vsyncpa [#allocation4], 1 }
 0x2aa   :  { %866 = vsyncpa [#allocation4 + $0x1], 1 }

</bundles_post_ra>
